<compile_context>
chip_gen: v6e
topology: v6e:2x2x1
jax: 0.10.0
libtpu: 0.0.40
codegen_flags: <defaults>
</compile_context>

<pallas_src>
import functools

import jax
import jax.numpy as jnp
from jax.experimental import pallas as pl
from jax.experimental.pallas import tpu as pltpu


# ---------------------------------------------------------------------------
# helpers
# ---------------------------------------------------------------------------
def _round_up(x, m):
    return (x + m - 1) // m * m


def _pad2(x, r, c):
    R, C = x.shape
    if R == r and C == c:
        return x
    return jnp.pad(x, ((0, r - R), (0, c - C)))


_VMEM_LIMIT = 32 * 1024 * 1024  # safe default on v5e/v6e/v7x


# ---------------------------------------------------------------------------
# kernel 1: tiled matmul  out = x @ w_t   (w_t already [K, N], bf16 in / f32 acc)
# ---------------------------------------------------------------------------
def _matmul_kernel_acc(x_ref, w_ref, o_ref, acc_ref):
    # bf16 (or other) output: accumulate in f32 scratch, cast on the last K step
    @pl.when(pl.program_id(2) == 0)
    def _():
        acc_ref[...] = jnp.zeros_like(acc_ref)

    acc_ref[...] += jnp.dot(x_ref[...], w_ref[...],
                            preferred_element_type=jnp.float32)

    @pl.when(pl.program_id(2) == pl.num_programs(2) - 1)
    def _():
        o_ref[...] = acc_ref[...].astype(o_ref.dtype)


def _matmul_kernel_f32out(x_ref, w_ref, o_ref):
    # f32 output: accumulate directly into the VMEM-resident output block
    @pl.when(pl.program_id(2) == 0)
    def _():
        o_ref[...] = jnp.zeros_like(o_ref)

    o_ref[...] += jnp.dot(x_ref[...], w_ref[...],
                          preferred_element_type=jnp.float32)


def linear(x, w_t, *, tm=512, tn=512, tk=512, out_dtype=jnp.float32):
    """x: [M, K], w_t: [K, N] (pre-transposed) -> [M, N] with f32 accumulation."""
    M, K = x.shape
    Kw, N = w_t.shape
    assert K == Kw
    x = x.astype(w_t.dtype)  # bf16 operands for the MXU

    tm = min(tm, _round_up(M, 16))
    tn = min(tn, _round_up(N, 128))
    tk = min(tk, _round_up(K, 128))
    Mp, Np, Kp = _round_up(M, tm), _round_up(N, tn), _round_up(K, tk)
    xp = _pad2(x, Mp, Kp)
    wp = _pad2(w_t, Kp, Np)

    if out_dtype == jnp.float32:
        kernel = _matmul_kernel_f32out
        scratch = []
    else:
        kernel = _matmul_kernel_acc
        scratch = [pltpu.VMEM((tm, tn), jnp.float32)]

    out_bytes = jnp.dtype(out_dtype).itemsize
    out = pl.pallas_call(
        kernel,
        grid=(Mp // tm, Np // tn, Kp // tk),
        in_specs=[
            pl.BlockSpec((tm, tk), lambda i, j, k: (i, k)),
            pl.BlockSpec((tk, tn), lambda i, j, k: (k, j)),
        ],
        out_specs=pl.BlockSpec((tm, tn), lambda i, j, k: (i, j)),
        out_shape=jax.ShapeDtypeStruct((Mp, Np), out_dtype),
        scratch_shapes=scratch,
        compiler_params=pltpu.CompilerParams(
            dimension_semantics=("parallel", "parallel", "arbitrary"),
            vmem_limit_bytes=_VMEM_LIMIT,
        ),
        cost_estimate=pl.CostEstimate(
            flops=2 * Mp * Np * Kp,
            transcendentals=0,
            bytes_accessed=2 * Mp * Kp + 2 * Kp * Np + out_bytes * Mp * Np,
        ),
    )(xp, wp)
    if Mp != M or Np != N:
        out = out[:M, :N]
    return out


# ---------------------------------------------------------------------------
# kernel 2: fused per-head RMSNorm + RoPE for q AND k, reading the q / k column
#           ranges of the packed qkv matrix directly (no XLA slicing), writing
#           token-major 2-D [T, H*D] outputs (lane-dense store).
#   cos_ref : [tt, D]  = [cos | cos]
#   sin_ref : [tt, D]  = [-sin | sin]   (sign folded on the host)
# ---------------------------------------------------------------------------
def _norm_rope_kernel(q_in_ref, k_in_ref, cos_ref, sin_ref, qw_ref, kw_ref,
                      qo_ref, ko_ref, *, eps, head_dim, num_q_heads, num_kv_heads):
    D = head_dim
    cos = cos_ref[...].astype(jnp.float32)[:, None, :]      # [tt, 1, D]
    sin = sin_ref[...].astype(jnp.float32)[:, None, :]      # [tt, 1, D]

    def _one(x_ref, w_ref, o_ref, H):
        tt = x_ref.shape[0]
        x = x_ref[...].reshape(tt, H, D).astype(jnp.float32)
        var = jnp.mean(x * x, axis=-1, keepdims=True)
        xn = x * jax.lax.rsqrt(var + eps)
        xn = xn * w_ref[...].reshape(1, 1, D).astype(jnp.float32)
        if D % 128 == 0:
            xr = pltpu.roll(xn, D // 2, 2)                   # XLU lane rotate, in place
        else:
            xr = jnp.concatenate([xn[..., D // 2:], xn[..., :D // 2]], axis=-1)
        out = xn * cos + xr * sin
        o_ref[...] = out.reshape(tt, H * D).astype(o_ref.dtype)

    _one(q_in_ref, qw_ref, qo_ref, num_q_heads)
    _one(k_in_ref, kw_ref, ko_ref, num_kv_heads)


def fused_norm_rope(qkv, cos, sin, q_norm_w, k_norm_w, eps, *,
                    num_q_heads, num_kv_heads, head_dim, out_dtype=jnp.bfloat16):
    """qkv: [Tp, (Hq+2Hk)*D] -> (q2 [Tp, Hq*D], k2 [Tp, Hk*D]) in out_dtype."""
    Tp, total = qkv.shape
    Hq, Hk, D = num_q_heads, num_kv_heads, head_dim
    assert total == (Hq + 2 * Hk) * D
    assert Hq % Hk == 0
    group = Hq // Hk

    # row tile: whole thing if small, else 128 (VMEM-safe on v7x with bf16 inputs)
    tt = Tp if Tp <= 256 else 128
    assert Tp % tt == 0

    qw = q_norm_w.reshape(1, D)
    kw = k_norm_w.reshape(1, D)

    kernel = functools.partial(_norm_rope_kernel, eps=eps, head_dim=D,
                               num_q_heads=Hq, num_kv_heads=Hk)
    qo, ko = pl.pallas_call(
        kernel,
        grid=(Tp // tt,),
        in_specs=[
            # q columns of qkv  : block width Hq*D, column-block 0
            pl.BlockSpec((tt, Hq * D), lambda i: (i, 0)),
            # k columns of qkv  : block width Hk*D, column-block `group` (= Hq*D offset)
            pl.BlockSpec((tt, Hk * D), lambda i: (i, group)),
            pl.BlockSpec((tt, D), lambda i: (i, 0)),
            pl.BlockSpec((tt, D), lambda i: (i, 0)),
            pl.BlockSpec((1, D), lambda i: (0, 0)),
            pl.BlockSpec((1, D), lambda i: (0, 0)),
        ],
        out_specs=[
            pl.BlockSpec((tt, Hq * D), lambda i: (i, 0)),
            pl.BlockSpec((tt, Hk * D), lambda i: (i, 0)),
        ],
        out_shape=[
            jax.ShapeDtypeStruct((Tp, Hq * D), out_dtype),
            jax.ShapeDtypeStruct((Tp, Hk * D), out_dtype),
        ],
        compiler_params=pltpu.CompilerParams(
            dimension_semantics=("parallel",),
            vmem_limit_bytes=_VMEM_LIMIT,
        ),
    )(qkv, qkv, cos, sin, qw, kw)
    return qo, ko


# ---------------------------------------------------------------------------
# kernel 3: flash-style causal GQA attention, token-major in/out.
#   grid = (kv_heads, q_blocks, kv_blocks)
#   q2 : [Tp, Hq*D]   block (tq, group*D)  at (qi, h)
#   k2 : [Tp, Hk*D]   block (tkv, D)       at (min(ki,qi), h)          <- no DMA for
#   v  : qkv matrix   block (tkv, D)       at (min(ki,qi), Hq+Hk+h)       skipped blocks
#   out: [Tp, Hq*D]   block (tq, group*D)  at (qi, h)   (lane-dense store)
# ---------------------------------------------------------------------------
def _flash_attn_kernel(q_ref, k_ref, v_ref, o_ref, m_sc, l_sc, acc_sc,
                       *, scale, tile, group, head_dim):
    D = head_dim
    rows = tile * group
    qi = pl.program_id(1)
    ki = pl.program_id(2)

    @pl.when(ki == 0)
    def _():
        m_sc[...] = jnp.full_like(m_sc, -1e30)
        l_sc[...] = jnp.zeros_like(l_sc)
        acc_sc[...] = jnp.zeros_like(acc_sc)

    # tq == tkv, so a kv block is fully in the causal future iff ki > qi
    @pl.when(ki <= qi)
    def _():
        # fold q heads into rows: row = token*group + head_in_group
        q = q_ref[...].reshape(rows, D)                      # bf16
        k = k_ref[...]                                       # [tile, D] bf16
        v = v_ref[...]                                       # [tile, D] bf16

        s = jax.lax.dot_general(q, k, (((1,), (1,)), ((), ())),
                                preferred_element_type=jnp.float32) * scale

        def update(s_):
            m_prev = m_sc[...]
            m_new = jnp.maximum(m_prev, jnp.max(s_, axis=-1, keepdims=True))
            alpha = jnp.exp(m_prev - m_new)
            p = jnp.exp(s_ - m_new)
            l_sc[...] = alpha * l_sc[...] + jnp.sum(p, axis=-1, keepdims=True)
            acc_sc[...] = alpha * acc_sc[...] + jax.lax.dot_general(
                p.astype(v.dtype), v, (((1,), (0,)), ((), ())),
                preferred_element_type=jnp.float32)
            m_sc[...] = m_new

        @pl.when(ki == qi)       # only diagonal blocks need the causal mask
        def _():
            tok = jax.lax.broadcasted_iota(jnp.int32, (tile, group, tile), 0)
            tok = tok.reshape(rows, tile)                    # token index per row
            col = jax.lax.broadcasted_iota(jnp.int32, (rows, tile), 1)
            update(jnp.where(col <= tok, s, -1e30))

        @pl.when(ki < qi)        # strictly-past blocks: unmasked
        def _():
            update(s)

    @pl.when(ki == pl.num_programs(2) - 1)
    def _():
        inv_l = pl.reciprocal(l_sc[...], approx=True)
        o_ref[...] = (acc_sc[...] * inv_l).reshape(tile, group * D).astype(o_ref.dtype)


def flash_attention(q2, k2, qkv, scale, *, num_q_heads, num_kv_heads, head_dim, tile):
    """q2: [Tp, Hq*D], k2: [Tp, Hk*D], qkv: [Tp, (Hq+2Hk)*D] -> [Tp, Hq*D]."""
    Tp = q2.shape[0]
    Hq, Hk, D = num_q_heads, num_kv_heads, head_dim
    assert Hq % Hk == 0
    group = Hq // Hk
    assert Tp % tile == 0
    nblk = Tp // tile
    v_col0 = Hq + Hk         # column-block offset of V inside qkv (D-wide blocks)

    kernel = functools.partial(_flash_attn_kernel, scale=scale, tile=tile,
                               group=group, head_dim=D)
    out = pl.pallas_call(
        kernel,
        grid=(Hk, nblk, nblk),
        in_specs=[
            pl.BlockSpec((tile, group * D), lambda h, qi, ki: (qi, h)),
            # clamp the kv block index so causally-skipped blocks alias the previous
            # block and their HBM DMA is elided
            pl.BlockSpec((tile, D), lambda h, qi, ki: (jnp.minimum(ki, qi), h)),
            pl.BlockSpec((tile, D),
                         lambda h, qi, ki: (jnp.minimum(ki, qi), v_col0 + h)),
        ],
        out_specs=pl.BlockSpec((tile, group * D), lambda h, qi, ki: (qi, h)),
        out_shape=jax.ShapeDtypeStruct((Tp, Hq * D), q2.dtype),
        scratch_shapes=[
            pltpu.VMEM((tile * group, 1), jnp.float32),   # m
            pltpu.VMEM((tile * group, 1), jnp.float32),   # l
            pltpu.VMEM((tile * group, D), jnp.float32),   # acc
        ],
        compiler_params=pltpu.CompilerParams(
            dimension_semantics=("parallel", "parallel", "arbitrary"),
            vmem_limit_bytes=_VMEM_LIMIT,
        ),
        cost_estimate=pl.CostEstimate(
            flops=2 * Hq * Tp * Tp * D,              # ~causal half of 4*Hq*Tp^2*D
            transcendentals=Hq * Tp * Tp // 2,
            bytes_accessed=2 * Tp * (2 * Hq * D + 2 * Hk * D),
        ),
    )(q2, k2, qkv)
    return out


# ---------------------------------------------------------------------------
# Qwen3Attention (JAX / Pallas), tp_size == 1
# ---------------------------------------------------------------------------
class Qwen3AttentionPallas:
    def __init__(self, hidden_size, num_heads, num_kv_heads,
                 max_position=4096, head_dim=None, rms_norm_eps=1e-6,
                 rope_theta=10000.0, key=None):
        self.hidden_size = hidden_size
        self.num_heads = num_heads
        self.num_kv_heads = num_kv_heads
        self.head_dim = head_dim or hidden_size // num_heads
        self.q_size = self.num_heads * self.head_dim
        self.kv_size = self.num_kv_heads * self.head_dim
        self.scaling = self.head_dim ** -0.5
        self.eps = rms_norm_eps

        key = key if key is not None else jax.random.PRNGKey(0)
        k1, k2, k3, k4 = jax.random.split(key, 4)
        qkv_out = (self.num_heads + 2 * self.num_kv_heads) * self.head_dim
        # weights pre-transposed ([K, N]) and cast to bf16 once at init
        self.wqkv_t = (0.02 * jax.random.normal(
            k1, (hidden_size, qkv_out), jnp.float32)).astype(jnp.bfloat16)
        self.wo_t = (0.02 * jax.random.normal(
            k2, (self.q_size, hidden_size), jnp.float32)).astype(jnp.bfloat16)
        self.q_norm_w = 1.0 + 0.1 * jax.random.normal(k3, (self.head_dim,), jnp.float32)
        self.k_norm_w = 1.0 + 0.1 * jax.random.normal(k4, (self.head_dim,), jnp.float32)

        # rotary cache: full head_dim, duplicated cos halves and sign-folded sin
        rd = self.head_dim
        inv_freq = 1.0 / (rope_theta ** (jnp.arange(0, rd, 2, dtype=jnp.float32) / rd))
        t = jnp.arange(max_position, dtype=jnp.float32)
        freqs = jnp.einsum("i,j->ij", t, inv_freq)                     # [P, D/2]
        cos, sin = jnp.cos(freqs), jnp.sin(freqs)
        self.cos_cache = jnp.concatenate([cos, cos], axis=-1)          # [P, D]
        self.sin_cache = jnp.concatenate([-sin, sin], axis=-1)         # [P, D]

    def __call__(self, positions, hidden_states):
        T = hidden_states.shape[0]
        D, Hq, Hk = self.head_dim, self.num_heads, self.num_kv_heads

        # one shared row tile for attention / norm+RoPE => one consistent padding
        tile = _round_up(T, 16) if T <= 256 else 256
        Tp = _round_up(T, tile)
        if Tp != T:
            hidden_states = jnp.pad(hidden_states, ((0, Tp - T), (0, 0)))
            positions = jnp.pad(positions, (0, Tp - T))

        # QKV projection directly to bf16 (halves activation HBM traffic)
        qkv = linear(hidden_states, self.wqkv_t, out_dtype=jnp.bfloat16)

        cos = self.cos_cache[positions]                                # [Tp, D]
        sin = self.sin_cache[positions]                                # [Tp, D]

        # fused q-norm + k-norm + RoPE, reading qkv columns via BlockSpec offsets
        q2, k2 = fused_norm_rope(qkv, cos, sin, self.q_norm_w, self.k_norm_w,
                                 self.eps, num_q_heads=Hq, num_kv_heads=Hk,
                                 head_dim=D)

        # flash attention; V is read straight out of the packed qkv matrix
        o = flash_attention(q2, k2, qkv, self.scaling, num_q_heads=Hq,
                            num_kv_heads=Hk, head_dim=D, tile=tile)    # [Tp, Hq*D]

        out = linear(o, self.wo_t, out_dtype=jnp.float32)              # [Tp, hidden]
        return out[:T]


# ---------------------------------------------------------------------------
# pure-JAX reference (bf16 matmul operands / bf16 qkv / f32 accumulate,
# mirroring the kernel dataflow)
# ---------------------------------------------------------------------------
def reference(mod, positions, hidden_states):
    T = hidden_states.shape[0]
    D = mod.head_dim
    half = D // 2

    x = hidden_states.astype(jnp.bfloat16)
    qkv = jnp.dot(x, mod.wqkv_t,
                  preferred_element_type=jnp.float32).astype(jnp.bfloat16)
    q = qkv[:, :mod.q_size].astype(jnp.float32).reshape(T, mod.num_heads, D)
    k = qkv[:, mod.q_size:mod.q_size + mod.kv_size].astype(
        jnp.float32).reshape(T, mod.num_kv_heads, D)
    v = qkv[:, mod.q_size + mod.kv_size:].reshape(T, mod.num_kv_heads, D)  # bf16

    def rmsnorm(x, w):
        var = jnp.mean(x * x, axis=-1, keepdims=True)
        return x * jax.lax.rsqrt(var + mod.eps) * w

    cos = mod.cos_cache[positions][:, :half][:, None, :]   # [T, 1, D/2]
    sin = mod.sin_cache[positions][:, half:][:, None, :]   # +sin part

    def rope(x):
        x1, x2 = x[..., :half], x[..., half:]
        return jnp.concatenate([x1 * cos - x2 * sin, x2 * cos + x1 * sin], axis=-1)

    q = rope(rmsnorm(q, mod.q_norm_w)).astype(jnp.bfloat16)
    k = rope(rmsnorm(k, mod.k_norm_w)).astype(jnp.bfloat16)

    group = mod.num_heads // mod.num_kv_heads
    k = jnp.repeat(k, group, axis=1)
    v = jnp.repeat(v, group, axis=1)

    s = jnp.einsum("qhd,khd->hqk", q, k,
                   preferred_element_type=jnp.float32) * mod.scaling
    mask = jnp.tril(jnp.ones((T, T), bool))
    s = jnp.where(mask[None], s, -1e30)
    p = jax.nn.softmax(s, axis=-1)
    o = jnp.einsum("hqk,khd->qhd", p.astype(jnp.bfloat16), v,
                   preferred_element_type=jnp.float32)
    o = o.reshape(T, mod.q_size).astype(jnp.bfloat16)
    return jnp.dot(o, mod.wo_t, preferred_element_type=jnp.float32)


# ---------------------------------------------------------------------------
if __name__ == "__main__":
    hidden_size = 128
    num_heads = 4
    num_kv_heads = 2
    head_dim = 128          # real Qwen3 head_dim (lane-dense, exercises pltpu.roll)
    T = 40                  # not a tile multiple -> exercises the padding paths

    key = jax.random.PRNGKey(0)
    k_mod, k_x = jax.random.split(key)
    mod = Qwen3AttentionPallas(hidden_size, num_heads, num_kv_heads,
                               head_dim=head_dim, key=k_mod)

    hidden_states = jax.random.normal(k_x, (T, hidden_size), jnp.float32)
    positions = jnp.arange(T, dtype=jnp.int32)

    out = jax.block_until_ready(mod(positions, hidden_states))
    ref = reference(mod, positions, hidden_states)

    assert out.shape == (T, hidden_size)
    max_err = float(jnp.max(jnp.abs(out - ref)))
    assert jnp.allclose(out, ref, rtol=2e-2, atol=2e-2), \
        f"mismatch vs reference (max abs err {max_err})"

    print("KERNEL_OK")
</pallas_src>

<mosaic_0001>
module attributes {stable_mosaic.version = 11 : i64} {
  func.func @_matmul_kernel_acc(%arg0: i32, %arg1: i32, %arg2: i32, %arg3: memref<48x128xbf16, #tpu.memory_space<vmem>>, %arg4: memref<128x512xbf16, #tpu.memory_space<vmem>>, %arg5: memref<48x512xbf16, #tpu.memory_space<vmem>>, %arg6: memref<48x512xf32, #tpu.memory_space<vmem>>) attributes {dimension_semantics = [#tpu.dimension_semantics<parallel>, #tpu.dimension_semantics<parallel>, #tpu.dimension_semantics<arbitrary>], iteration_bounds = array<i64: 1, 2, 1>, scalar_prefetch = 0 : i64, scratch_operands = 1 : i64, tpu.core_type = #tpu.core_type<tc>, window_params = [{transform_indices = @transform_0, window_bounds = array<i64: 48, 128>}, {transform_indices = @transform_1, window_bounds = array<i64: 128, 512>}, {transform_indices = @transform_2, window_bounds = array<i64: 48, 512>}]} {
    %c0_i32 = arith.constant 0 : i32
    %0 = arith.cmpi eq, %arg2, %c0_i32 : i32
    %1 = arith.extui %0 : i1 to i32
    %c0_i32_0 = arith.constant 0 : i32
    %2 = arith.cmpi ne, %1, %c0_i32_0 : i32
    scf.if %2 {
      %cst_10 = arith.constant 0.000000e+00 : f32
      %12 = vector.broadcast %cst_10 : f32 to vector<48x512xf32>
      %c0_11 = arith.constant 0 : index
      %c0_12 = arith.constant 0 : index
      %13 = vector.load %arg6[%c0_11, %c0_12] : memref<48x512xf32, #tpu.memory_space<vmem>>, vector<48x512xf32>
      tpu.vector_store %arg6[%c0_11, %c0_12], %12 {strides = array<i32>} : memref<48x512xf32, #tpu.memory_space<vmem>>, vector<48x512xf32>,
    } else {
    }
    %c0 = arith.constant 0 : index
    %c0_1 = arith.constant 0 : index
    %3 = vector.load %arg6[%c0, %c0_1] : memref<48x512xf32, #tpu.memory_space<vmem>>, vector<48x512xf32>
    %c0_2 = arith.constant 0 : index
    %c0_3 = arith.constant 0 : index
    %4 = vector.load %arg3[%c0_2, %c0_3] : memref<48x128xbf16, #tpu.memory_space<vmem>>, vector<48x128xbf16>
    %c0_4 = arith.constant 0 : index
    %c0_5 = arith.constant 0 : index
    %5 = vector.load %arg4[%c0_4, %c0_5] : memref<128x512xbf16, #tpu.memory_space<vmem>>, vector<128x512xbf16>
    %cst = arith.constant dense<0.000000e+00> : vector<48x512xf32>
    %6 = tpu.matmul %4, %5, %cst {dimension_numbers = #tpu.dot_dimension_numbers<[1], [0], [0], [1], [0, 0, 1, 1], [], []>} : vector<48x128xbf16>, vector<128x512xbf16>, vector<48x512xf32> -> vector<48x512xf32>
    %7 = arith.addf %3, %6 : vector<48x512xf32>
    %c0_6 = arith.constant 0 : index
    %c0_7 = arith.constant 0 : index
    %8 = vector.load %arg6[%c0_6, %c0_7] : memref<48x512xf32, #tpu.memory_space<vmem>>, vector<48x512xf32>
    tpu.vector_store %arg6[%c0_6, %c0_7], %7 {strides = array<i32>} : memref<48x512xf32, #tpu.memory_space<vmem>>, vector<48x512xf32>,
    %c0_i32_8 = arith.constant 0 : i32
    %9 = arith.cmpi eq, %arg2, %c0_i32_8 : i32
    %10 = arith.extui %9 : i1 to i32
    %c0_i32_9 = arith.constant 0 : i32
    %11 = arith.cmpi ne, %10, %c0_i32_9 : i32
    scf.if %11 {
      %c0_10 = arith.constant 0 : index
      %c0_11 = arith.constant 0 : index
      %12 = vector.load %arg6[%c0_10, %c0_11] : memref<48x512xf32, #tpu.memory_space<vmem>>, vector<48x512xf32>
      %13 = arith.truncf %12 : vector<48x512xf32> to vector<48x512xbf16>
      %c0_12 = arith.constant 0 : index
      %c0_13 = arith.constant 0 : index
      %14 = vector.load %arg5[%c0_12, %c0_13] : memref<48x512xbf16, #tpu.memory_space<vmem>>, vector<48x512xbf16>
      tpu.vector_store %arg5[%c0_12, %c0_13], %13 {strides = array<i32>} : memref<48x512xbf16, #tpu.memory_space<vmem>>, vector<48x512xbf16>,
    } else {
    }
    return
  }
  func.func @transform_0(%arg0: i32, %arg1: i32, %arg2: i32) -> (i32, i32) {
    %c0_i32 = arith.constant 0 : i32
    return %arg0, %arg2 : i32, i32
  }
  func.func @transform_1(%arg0: i32, %arg1: i32, %arg2: i32) -> (i32, i32) {
    %c0_i32 = arith.constant 0 : i32
    return %arg2, %arg1 : i32, i32
  }
  func.func @transform_2(%arg0: i32, %arg1: i32, %arg2: i32) -> (i32, i32) {
    %c0_i32 = arith.constant 0 : i32
    return %arg0, %arg1 : i32, i32
  }
}

</mosaic_0001>

<bundles_post_ra>
// kernel: tpu_custom_call.1
= control target key start
LH: loop header
LB: loop body
LE: loop exit
PB: predicated region body
PF: predicated region fallthrough
CT: control target
= control target key end

     0   :  { %7 = vsyncpa [#allocation4], 0  ;;  %s1504_s0 = inlined_call_operand.hbm [shape: bf16[48,128], index: 0, kind: input, shape index: {}]   ;;  %s1505_s1 = inlined_call_operand.hbm [shape: bf16[128,1024], index: 1, kind: input, shape index: {}]   ;;  %s1506_s2 = inlined_call_operand.hbm [shape: bf16[48,1024], index: 2, kind: output, shape index: {}]  }
   0x1   :  { %8 = vsyncpa [#allocation7], 0 }
   0x2   :  { %10 = vsyncpa [#allocation7 + $0x1], 0 }
   0x3   :  { %11 = vsyncpa [#allocation5], 0 }
   0x4   :  { %13 = vsyncpa [#allocation5 + $0x1], 0  ;;  %s1273_s9 = smov 0   ;;  %s1275_s10 = smov 0  }
   0x5   :  { %s1277_s11 = smov 0   ;;  %s1279_s12 = smov 0  }
   0x6   :  { %s1281_s13 = smov 0   ;;  %s1283_s14 = smov 0  }
   0x7 LB: > { %1511 = sst [smem:[#allocation12_spill]] %s1244_s14  ;;  %s896_s15 = sadd.s32 4294967295, %s1244_s14   ;;  %s1244_s14 = sphi %s1283_s14, %s1530_s14   ;;  %s1240_s13 = sphi %s1281_s13, %s1529_s13   ;;  %s1236_s12 = sphi %s1279_s12, %s1528_s12   ;;  %s1232_s11 = sphi %s1277_s11, %s1527_s11   ;;  %s1228_s10 = sphi %s1275_s10, %s1526_s10   ;;  %s1224_s9 = sphi %s1273_s9, %s1525_s9  }
   0x8   : > { %s897_s16 = sadd.s32 4294967294, %s1244_s14   ;;  %p82_p0 = scmp.ne.s32.totalorder %s1232_s11, %s1228_s10 }
   0x9   : > { %p83_p1 = scmp.eq.s32.totalorder %s1244_s14, 0  ;;  %p88_p2 = scmp.ne.s32.totalorder %s1228_s10, %s1224_s9 }
   0xa   : > { %p1310_p3 = scmp.eq.s32.totalorder %s896_s15, 0  ;;  %p114_p5 = scmp.eq.s32.totalorder %s896_s15, 1 }
   0xb   : > { %p1314_p4 = por %p83_p1, %p82_p0  ;;  %p120_p7 = scmp.eq.s32.totalorder %s897_s16, 1 }
   0xc   : > { %p1320_p6 = por %p1310_p3, %p88_p2  ;;  %p1324_p8 = por %p114_p5, %p82_p0 }
   0xd   : > { %p898_p9 = scmp.ge.s32.totalorder %s1244_s14, 1  ;;  %p1329_p10 = por %p120_p7, %p88_p2 }
   0xe   : > { %s1514_s19 = scalar_select %p1320_p6, 1, 0 }
   0xf   : > { %s1515_s20 = scalar_select %p1324_p8, 1, 0 }
  0x10   : > { %s1516_s21 = scalar_select %p1329_p10, 1, 0 }
  0x11   : > { %p127_p11 = scmp.lt.s32.totalorder %s1244_s14, 3  ;;  %s1246_s23 = smov [#allocation3]  }
  0x12   : > { %s143_s24 = sshll.u32 %s1246_s23, 4  ;;  %p994_p1 = scmp.lt.s32.totalorder %s1244_s14, 2  ;;  %s144_s24 = int_to_ptr.vmem [resolvable:$true] %s143_s24 }
  0x13   : > { %p1334_p12 = pnand %p898_p9, %p127_p11  ;;  %s34_s27 = sadd.s32 1, %s1240_s13 }
  0x14   : > { %p1350_p2 = pnand %p994_p1, %p1314_p4  ;;  %s1117_s28 = scalar_lea.vmem %s144_s24, 384 }
  0x15   : > { %p981_p13 = pneg %p1334_p12  ;;  %p1118_p9 = scmp.ne.s32.totalorder %s144_s24, %s1117_s28 }
  0x16   : > { %p1125_p0 = scmp.lt.s32.totalorder %s144_s24, %s144_s24  ;;  %p1126_p8 = scmp.lt.s32.totalorder %s1117_s28, %s1117_s28 }
  0x17   : > { %p1344_p5 = pnand %p981_p13, %p1310_p3 }
  0x18   : > { %p1127_p6 = por %p1126_p8, %p1125_p0 }
  0x19   : > { %p1108_p7 = pneg %p1344_p5 }
  0x1b   : > { %p1120_p11 = pnand %p1118_p9, %p1108_p7 }
  0x1d   : > { %p1121_p10 = pneg %p1120_p11 }
  0x1f   : > { %p1128_p13 = pnand %p1127_p6, %p1121_p10 }
  0x21   : > { %1131 = shalt.err (!%p1128_p13)
}
  0x22   : > { %s1247_s29 = smov 64   ;;  %s1248_s30 = smov 4  }
  0x23   : > { %984 = dma.hbm_to_vmem [thread:$0]  (!%p1344_p5), %s1504_s0, 384, %s144_s24, [#allocation4], %s1247_s29, %s1247_s29, %s1248_s30  }
  0x24   : > { %p36_p4 = scmp.ge.s32.totalorder %s34_s27, 2  ;;  %s75_s5 = sadd.s32 1, %s1232_s11 }
  0x25   : > { %s157_s6 = sand.u32 1, %s1232_s11   ;;  %s958_s15 = sshll.u32 %s1240_s13, 8 }
  0x26   : > { %s1532_s27 = smov (%p36_p4, %s34_s27), 0  ;;  %s901_s7 = sshll.u32 %s157_s6, 8 }
  0x27   : > { %s71_s8 = ssub.s32 %s1240_s13, %s1532_s27  ;;  %s170_s23 = scalar_lea.hbm %s1505_s1, %s958_s15 }
  0x28   : > { %p73_p6 = scmp.eq.s32.totalorder %s71_s8, 0  ;;  %s161_s25 = scalar_lea.vmem [#allocation6], %s901_s7 }
  0x29   : > { %s171_s28 = sshll.u32 %s161_s25, 4  ;;  %s158_s24 = scalar_lea.sflag [#allocation7], %s157_s6  ;;  %s172_s28 = int_to_ptr.vmem [resolvable:$true] %s171_s28 }
  0x2a   : > { %s1373_s14 = scalar_select %p73_p6, %s1232_s11, %s75_s5  }
  0x2b   : > { %p1134_p8 = pneg %p1350_p2  ;;  %s1145_s29 = scalar_lea.vmem %s172_s28, 4096 }
  0x2c   : > { %p1146_p10 = scmp.ne.s32.totalorder %s172_s28, %s1145_s29  ;;  %s1249_s30 = smov [#allocation6]  }
  0x2d   : > { %s1150_s3 = sshll.u32 %s1249_s30, 4  ;;  %s1151_s3 = int_to_ptr.vmem [resolvable:$false] %s1150_s3 }
  0x2e   : > { %p1148_p0 = pnand %p1146_p10, %p1134_p8  ;;  %s1152_s4 = scalar_lea.vmem %s1151_s3, 8192 }
  0x2f   : > { %p1153_p5 = scmp.lt.s32.totalorder %s172_s28, %s1151_s3  ;;  %p1154_p7 = scmp.lt.s32.totalorder %s1152_s4, %s1145_s29 }
  0x30   : > { %p1149_p1 = pneg %p1148_p0 }
  0x31   : > { %p1155_p9 = por %p1154_p7, %p1153_p5 }
  0x33   : > { %p1156_p11 = pnand %p1155_p9, %p1149_p1 }
  0x35   : > { %1159 = shalt.err (!%p1156_p11)
}
  0x36   : > { %s1250_s7 = smov 512   ;;  %s1251_s5 = smov 256  }
  0x37   : > { %s1252_s8 = smov 16   ;;  %183 = sbr.rel (%p1334_p12) target bundleno = 331 (0x14b), region = 28 }
  0x38   : > { %988 = dma.hbm_to_vmem [thread:$0]  (!%p1350_p2), %s170_s23, 4096, %s172_s28, %s158_s24, %s1250_s7, %s1251_s5, %s1252_s8  }
  0x3c   : > { %1211 = dma.done.wait (%p1310_p3), [#allocation4], 384  }
  0x3d   : > { %1213 = vsyncadd (%p1310_p3), [#allocation4], 4294966912  ;;  %s1386_s6 = sand.u32 1, %s1228_s10   ;;  %p1520_p2 = scmp.ne.s32.totalorder %s1514_s19, 0 }
  0x3e   : > { %s906_s15 = sshll.u32 %s1386_s6, 8  ;;  %s190_s16 = scalar_lea.sflag [#allocation7], %s1386_s6 }
  0x3f   : > { %s1390_s18 = scalar_lea.vmem [#allocation6], %s906_s15 }
  0x40   : > { %1215 = dma.done.wait (%p1520_p2), %s190_s16, 4096  }
  0x41   : > { %1217 = vsyncadd (%p1520_p2), %s190_s16, 4294963200  ;;  %v1253_v0 = vmov 0   ;;  %v1055_v1 = vld [vmem:[%s1390_s18 + $0xe4] ss:$16 sps:$4 sm:$0xff]   ;;  %v1057_v2 = vld [vmem:[%s1390_s18 + $0xec] ss:$16 sps:$4 sm:$0xff]  }
  0x42   : > { %520 = vmatprep.mubr.bf16.mxu0 %v1253_v0  ;;  %583 = vmatprep.mubr.bf16.mxu1 %v1253_v0  ;;  %v1059_v3 = vld [vmem:[%s1390_s18 + $0xe0] ss:$16 sps:$4 sm:$0xff]   ;;  %v1060_v4 = vld [vmem:[%s1390_s18 + $0xe8] ss:$16 sps:$4 sm:$0xff]   ;;  %v1061_v5 = vld [vmem:[%s1390_s18 + $0xc4] ss:$16 sps:$4 sm:$0xff]  }
  0x43   : > { %488 = vmatprep.subr.bf16.mxu0 %v1055_v1  ;;  %551 = vmatprep.subr.bf16.mxu1 %v1057_v2  ;;  %v1063_v6 = vld [vmem:[%s1390_s18 + $0xcc] ss:$16 sps:$4 sm:$0xff]   ;;  %v1065_v7 = vld [vmem:[%s1390_s18 + $0xc0] ss:$16 sps:$4 sm:$0xff]   ;;  %v1066_v8 = vld [vmem:[%s1390_s18 + $0xc8] ss:$16 sps:$4 sm:$0xff]  }
  0x44   : > { %489 = vmatpush1.bf16.msra.mxu0 %v1059_v3  ;;  %552 = vmatpush1.bf16.msra.mxu1 %v1060_v4  ;;  %v1067_v9 = vld [vmem:[%s1390_s18 + $0xa4] ss:$16 sps:$4 sm:$0xff]   ;;  %v1069_v10 = vld [vmem:[%s1390_s18 + $0xac] ss:$16 sps:$4 sm:$0xff]   ;;  %v1071_v11 = vld [vmem:[%s1390_s18 + $0xa0] ss:$16 sps:$4 sm:$0xff]  }
  0x45   : > { %490 = vmatprep.subr.bf16.mxu0 %v1061_v5  ;;  %553 = vmatprep.subr.bf16.mxu1 %v1063_v6  ;;  %v1072_v12 = vld [vmem:[%s1390_s18 + $0xa8] ss:$16 sps:$4 sm:$0xff]   ;;  %v1073_v13 = vld [vmem:[%s1390_s18 + $0x84] ss:$16 sps:$4 sm:$0xff]   ;;  %v1075_v14 = vld [vmem:[%s1390_s18 + $0x8c] ss:$16 sps:$4 sm:$0xff]  }
  0x46   : > { %v1077_v15 = vld [vmem:[%s1390_s18 + $0x80] ss:$16 sps:$4 sm:$0xff]   ;;  %v1078_v16 = vld [vmem:[%s1390_s18 + $0x88] ss:$16 sps:$4 sm:$0xff]   ;;  %v1079_v17 = vld [vmem:[%s1390_s18 + $0x64] ss:$16 sps:$4 sm:$0xff]  }
  0x47   : > { %v1081_v18 = vld [vmem:[%s1390_s18 + $0x6c] ss:$16 sps:$4 sm:$0xff]   ;;  %v1083_v19 = vld [vmem:[%s1390_s18 + $0x60] ss:$16 sps:$4 sm:$0xff]   ;;  %v1084_v20 = vld [vmem:[%s1390_s18 + $0x68] ss:$16 sps:$4 sm:$0xff]  }
  0x48   : > { %491 = vmatpush1.bf16.msra.mxu0 %v1065_v7  ;;  %554 = vmatpush1.bf16.msra.mxu1 %v1066_v8  ;;  %v1085_v21 = vld [vmem:[%s1390_s18 + $0x44] ss:$16 sps:$4 sm:$0xff]   ;;  %v1087_v22 = vld [vmem:[%s1390_s18 + $0x4c] ss:$16 sps:$4 sm:$0xff]   ;;  %v1089_v23 = vld [vmem:[%s1390_s18 + $0x40] ss:$16 sps:$4 sm:$0xff]  }
  0x49   : > { %492 = vmatprep.subr.bf16.mxu0 %v1067_v9  ;;  %555 = vmatprep.subr.bf16.mxu1 %v1069_v10  ;;  %v1090_v24 = vld [vmem:[%s1390_s18 + $0x48] ss:$16 sps:$4 sm:$0xff]   ;;  %v1091_v25 = vld [vmem:[%s1390_s18 + $0x24] ss:$16 sps:$4 sm:$0xff]   ;;  %v1093_v26 = vld [vmem:[%s1390_s18 + $0x2c] ss:$16 sps:$4 sm:$0xff]  }
  0x4a   : > { %v1095_v27 = vld [vmem:[%s1390_s18 + $0x20] ss:$16 sps:$4 sm:$0xff]   ;;  %v1096_v28 = vld [vmem:[%s1390_s18 + $0x28] ss:$16 sps:$4 sm:$0xff]   ;;  %v1097_v29 = vld [vmem:[%s1390_s18 + $0x4] ss:$16 sps:$4 sm:$0xff]  }
  0x4b   : > { %v1099_v30 = vld [vmem:[%s1390_s18 + $0xc] ss:$16 sps:$4 sm:$0xff]   ;;  %v1101_v31 = vld [vmem:[%s1390_s18] ss:$16 sps:$4 sm:$0xff]   ;;  %v1102_v32 = vld [vmem:[%s1390_s18 + $0x8] ss:$16 sps:$4 sm:$0xff]  }
  0x4c   : > { %493 = vmatpush1.bf16.msra.mxu0 %v1071_v11  ;;  %556 = vmatpush1.bf16.msra.mxu1 %v1072_v12  ;;  %v1103_v33 = vld [vmem:[#allocation3] sm:$0xff]   ;;  %v1104_v34 = vld [vmem:[#allocation3 + $0x8] sm:$0xff]   ;;  %v1105_v35 = vld [vmem:[#allocation3 + $0x10] sm:$0xff]   ;;  %s972_s17 = smul.u32 96, %s1386_s6  ;;  %s971_s22 = sshll.u32 %s1236_s12, 8 }
  0x4d   : > { %494 = vmatprep.subr.bf16.mxu0 %v1073_v13  ;;  %557 = vmatprep.subr.bf16.mxu1 %v1075_v14  ;;  %s1452_s28 = scalar_lea.hbm %s1506_s2, %s971_s22  ;;  %s774_s12 = scalar_lea.sflag [#allocation5], %s1386_s6 }
  0x4e   : > { %s1435_s19 = scalar_lea.vmem [#allocation8], %s972_s17  ;;  %p1521_p12 = scmp.ne.s32.totalorder %s1515_s20, 0 }
  0x4f   : > { %s790_s26 = sshll.u32 %s1435_s19, 4  ;;  %s1254_s29 = smov [#allocation8]   ;;  %s1454_s26 = int_to_ptr.vmem [resolvable:$true] %s790_s26 }
  0x50   : > { %495 = vmatpush1.bf16.msra.mxu0 %v1077_v15  ;;  %558 = vmatpush1.bf16.msra.mxu1 %v1078_v16  ;;  %s1160_s24 = scalar_lea.vmem %s1454_s26, 1536  ;;  %s1164_s30 = sshll.u32 %s1254_s29, 4  ;;  %s1165_s30 = int_to_ptr.vmem [resolvable:$false] %s1164_s30 }
  0x51   : > { %496 = vmatprep.subr.bf16.mxu0 %v1079_v17  ;;  %559 = vmatprep.subr.bf16.mxu1 %v1081_v18  ;;  %p1161_p3 = scmp.ne.s32.totalorder %s1454_s26, %s1160_s24  ;;  %s1166_s3 = scalar_lea.vmem %s1165_s30, 3072 }
  0x52   : > { %p1167_p6 = scmp.lt.s32.totalorder %s1454_s26, %s1165_s30  ;;  %p1168_p8 = scmp.lt.s32.totalorder %s1166_s3, %s1160_s24 }
  0x53   : > { %p1162_p13 = pnand %p1161_p3, %p1521_p12 }
  0x54   : > { %497 = vmatpush1.bf16.msra.mxu0 %v1083_v19  ;;  %560 = vmatpush1.bf16.msra.mxu1 %v1084_v20  ;;  %p1169_p10 = por %p1168_p8, %p1167_p6 }
  0x55   : > { %498 = vmatprep.subr.bf16.mxu0 %v1085_v21  ;;  %561 = vmatprep.subr.bf16.mxu1 %v1087_v22  ;;  %p1163_p4 = pneg %p1162_p13 }
  0x57   : > { %p1170_p0 = pnand %p1169_p10, %p1163_p4 }
  0x58   : > { %499 = vmatpush1.bf16.msra.mxu0 %v1089_v23  ;;  %562 = vmatpush1.bf16.msra.mxu1 %v1090_v24 }
  0x59   : > { %500 = vmatprep.subr.bf16.mxu0 %v1091_v25  ;;  %563 = vmatprep.subr.bf16.mxu1 %v1093_v26 }
  0x5c   : > { %501 = vmatpush1.bf16.msra.mxu0 %v1095_v27  ;;  %564 = vmatpush1.bf16.msra.mxu1 %v1096_v28 }
  0x5d   : > { %502 = vmatprep.subr.bf16.mxu0 %v1097_v29  ;;  %565 = vmatprep.subr.bf16.mxu1 %v1099_v30 }
  0x60   : > { %503 = vmatpush1.bf16.msra.mxu0 %v1101_v31  ;;  %566 = vmatpush1.bf16.msra.mxu1 %v1102_v32 }
  0x63   : > { %521 = vmatmul.mubr.bf16.vlgmr.msra.gmra.mxu0 %v1103_v33  ;;  %584 = vmatmul.mubr.bf16.vlgmr.msra.gmra.mxu1 %v1103_v33 }
  0x64   : > { %530 = vmatprep.mubr.bf16.mxu0 %v1253_v0  ;;  %593 = vmatprep.mubr.bf16.mxu1 %v1253_v0 }
  0x6b   : > { %531 = vmatmul.mubr.bf16.gmra.mxu0 %v1104_v34  ;;  %594 = vmatmul.mubr.bf16.gmra.mxu1 %v1104_v34 }
  0x6c   : > { %540 = vmatprep.mubr.bf16.mxu0 %v1253_v0  ;;  %603 = vmatprep.mubr.bf16.mxu1 %v1253_v0 }
  0x73   : > { %541 = vmatmul.mubr.bf16.gmra.mxu0 %v1105_v35  ;;  %604 = vmatmul.mubr.bf16.gmra.mxu1 %v1105_v35 }
 0x123   : > { %v522_v36 = vpop.f32.mrf.mxu0  ;;  %v585_v37 = vpop.f32.mrf.mxu1 }
 0x125   : > { %v524_v38 = vpop.f32.mrf.mxu0  ;;  %v587_v39 = vpop.f32.mrf.mxu1 }
 0x126   : > { %v959_v40 = vpack.c.bf16 %v524_v38, %v522_v36  ;;  %v960_v41 = vpack.c.bf16 %v587_v39, %v585_v37 }
 0x127   : > { %v526_v42 = vpop.f32.mrf.mxu0  ;;  %v589_v43 = vpop.f32.mrf.mxu1 }
 0x128   : > { %761 = vst [vmem:[%s1435_s19] sm:$0xff] %v959_v40  ;;  %762 = vst [vmem:[%s1435_s19 + $0x8] sm:$0xff] %v960_v41 }
 0x129   : > { %v528_v44 = vpop.f32.mrf.mxu0  ;;  %v591_v45 = vpop.f32.mrf.mxu1 }
 0x12a   : > { %v961_v46 = vpack.c.bf16 %v528_v44, %v526_v42  ;;  %v962_v47 = vpack.c.bf16 %v591_v45, %v589_v43 }
 0x12b   : > { %v532_v48 = vpop.f32.mrf.mxu0  ;;  %v595_v49 = vpop.f32.mrf.mxu1 }
 0x12c   : > { %763 = vst [vmem:[%s1435_s19 + $0x10] sm:$0xff] %v961_v46  ;;  %764 = vst [vmem:[%s1435_s19 + $0x18] sm:$0xff] %v962_v47 }
 0x12d   : > { %v534_v50 = vpop.f32.mrf.mxu0  ;;  %v597_v51 = vpop.f32.mrf.mxu1 }
 0x12e   : > { %v963_v52 = vpack.c.bf16 %v534_v50, %v532_v48  ;;  %v964_v53 = vpack.c.bf16 %v597_v51, %v595_v49 }
 0x12f   : > { %v536_v54 = vpop.f32.mrf.mxu0  ;;  %v599_v55 = vpop.f32.mrf.mxu1 }
 0x130   : > { %765 = vst [vmem:[%s1435_s19 + $0x20] sm:$0xff] %v963_v52  ;;  %766 = vst [vmem:[%s1435_s19 + $0x28] sm:$0xff] %v964_v53 }
 0x131   : > { %v538_v56 = vpop.f32.mrf.mxu0  ;;  %v601_v57 = vpop.f32.mrf.mxu1 }
 0x132   : > { %v965_v58 = vpack.c.bf16 %v538_v56, %v536_v54  ;;  %v966_v59 = vpack.c.bf16 %v601_v57, %v599_v55 }
 0x133   : > { %v542_v60 = vpop.f32.mrf.mxu0  ;;  %v605_v61 = vpop.f32.mrf.mxu1 }
 0x134   : > { %767 = vst [vmem:[%s1435_s19 + $0x30] sm:$0xff] %v965_v58  ;;  %768 = vst [vmem:[%s1435_s19 + $0x38] sm:$0xff] %v966_v59 }
 0x135   : > { %v544_v62 = vpop.f32.mrf.mxu0  ;;  %v607_v63 = vpop.f32.mrf.mxu1 }
 0x136   : > { %v967_v0 = vpack.c.bf16 %v544_v62, %v542_v60  ;;  %v968_v1 = vpack.c.bf16 %v607_v63, %v605_v61 }
 0x137   : > { %v546_v2 = vpop.f32.mrf.mxu0  ;;  %v609_v3 = vpop.f32.mrf.mxu1 }
 0x138   : > { %769 = vst [vmem:[%s1435_s19 + $0x40] sm:$0xff] %v967_v0  ;;  %770 = vst [vmem:[%s1435_s19 + $0x48] sm:$0xff] %v968_v1 }
 0x139   : > { %v548_v4 = vpop.f32.mrf.mxu0  ;;  %v611_v5 = vpop.f32.mrf.mxu1 }
 0x13a   : > { %v969_v6 = vpack.c.bf16 %v548_v4, %v546_v2  ;;  %v970_v7 = vpack.c.bf16 %v611_v5, %v609_v3 }
 0x13c   : > { %771 = vst [vmem:[%s1435_s19 + $0x50] sm:$0xff] %v969_v6  ;;  %772 = vst [vmem:[%s1435_s19 + $0x58] sm:$0xff] %v970_v7 }
 0x13d   : > { %1173 = shalt.err (!%p1170_p0)
}
 0x13e   : > { %s1174_s4 = scalar_lea.hbm %s1452_s28, 1536  ;;  %s1178_s8 = scalar_lea.hbm %s1506_s2, 3072 }
 0x13f   : > { %p1175_p1 = scmp.ne.s32.totalorder %s1452_s28, %s1174_s4  ;;  %p1179_p9 = scmp.lt.s32.totalorder %s1452_s28, %s1506_s2 }
 0x140   : > { %p1180_p11 = scmp.lt.s32.totalorder %s1178_s8, %s1174_s4 }
 0x141   : > { %p1176_p5 = pnand %p1175_p1, %p1521_p12 }
 0x142   : > { %p1181_p2 = por %p1180_p11, %p1179_p9 }
 0x143   : > { %p1177_p7 = pneg %p1176_p5 }
 0x145   : > { %p1182_p3 = pnand %p1181_p2, %p1177_p7 }
 0x147   : > { %1185 = shalt.err (!%p1182_p3)
}
 0x148   : > { %s1255_s18 = smov 256   ;;  %s1256_s17 = smov 512  }
 0x149   : > { %s1257_s19 = smov 16  }
 0x14a   : > { %979 = dma.vmem_to_hbm [thread:$0]  (%p1521_p12), %s1454_s26, 1536, %s1452_s28, %s774_s12, %s1255_s18, %s1256_s17, %s1257_s19  }
 0x14b PF: > { %s1522_s22 = sld [smem:[#allocation12_spill]]  ;;  %s805_s23 = sand.u32 1, %s1224_s9  }
 0x14c   : > { %p1523_p13 = scmp.ne.s32.totalorder %s1516_s21, 0  ;;  %s806_s25 = scalar_lea.sflag [#allocation5], %s805_s23 }
 0x151   : > { %p1524_p4 = scmp.ge.s32.totalorder %s1522_s22, 2 }
 0x153   : > { %p990_p6 = pnand %p1524_p4, %p1523_p13 }
 0x155   : > { %p991_p8 = pneg %p990_p6 }
 0x157   : > { %1219 = dma.done.wait (%p991_p8), %s806_s25, 1536  }
 0x158   : > { %1221 = vsyncadd (%p991_p8), %s806_s25, 4294965760  ;;  %s19_s24 = sadd.s32 1, %s1522_s22   ;;  %s1525_s9 = smov %s1228_s10 }
 0x159   : > { %p16_p10 = scmp.ge.s32.totalorder %s19_s24, 4   ;;  %s1526_s10 = smov %s1232_s11 }
 0x15a   : > { %s1527_s11 = smov %s1373_s14  ;;  %s1528_s12 = smov %s1240_s13 }
 0x15b   : > { %s1529_s13 = smov %s1532_s27  ;;  %s1530_s14 = smov %s19_s24 }
 0x15c   :  { %18 = sbr.rel (!%p16_p10) target bundleno = 7 (0x7), region = 87 }
 0x161   :  { %811 = vsyncpa [#allocation4], 1 }
 0x162   :  { %813 = vsyncpa [#allocation4 + $0x1], 1 }
 0x163   :  { %814 = vsyncpa [#allocation7], 1 }
 0x164   :  { %816 = vsyncpa [#allocation7 + $0x1], 1 }
 0x165   :  { %817 = vsyncpa [#allocation5], 1 }
 0x166   :  { %819 = vsyncpa [#allocation5 + $0x1], 1 }

</bundles_post_ra>
